<compile_context>
chip_gen: v7x
topology: tpu7x:2x2x1
jax: 0.10.0
libtpu: 0.0.40
codegen_flags: <defaults>
</compile_context>

<pallas_src>
import jax
import jax.numpy as jnp
from jax import lax
from jax.experimental import pallas as pl
from jax.experimental.pallas import tpu as pltpu


def _round_up(x, m):
    return ((x + m - 1) // m) * m


def _make_kernel(n_rows, tile_r, tile_v):
    def kernel(lp_ref, tgt_ref, msk_ref, out_ref, acc_ref):
        # lp_ref:  (tile_r, tile_v)  log-prob tile (f32 or bf16)
        # tgt_ref: (tile_r, 1) i32   target class per row
        # msk_ref: (tile_r, 1) f32   mask per row
        # out_ref: (tile_r, 1) f32   -lp[r, tgt[r]] * msk[r] (written once)
        # acc_ref: (tile_r, 1) f32   VMEM scratch accumulator
        i = pl.program_id(0)          # row-tile index ("parallel")
        j = pl.program_id(1)          # vocab-tile index (reduction, last)

        @pl.when(j == 0)
        def _():
            acc_ref[...] = jnp.zeros_like(acc_ref)

        # Row validity for this (possibly ragged) row tile, computed only on
        # the cheap (tile_r, 1) side.
        row_id = lax.broadcasted_iota(jnp.int32, (tile_r, 1), 0) + i * tile_r
        row_valid = row_id < n_rows

        # Shift the target into tile-local lane coordinates instead of adding
        # j*tile_v to the wide iota (saves a full-tile vadd).  Invalid rows get
        # sentinel -1, which never matches a lane id in [0, tile_v), so garbage
        # lp / garbage targets in edge blocks are never selected.
        tgt_local = jnp.where(row_valid, tgt_ref[...] - j * tile_v, -1)

        lane = lax.broadcasted_iota(jnp.int32, (tile_r, tile_v), 1)
        hit = lane == tgt_local                              # (tile_r, tile_v)
        # Exactly one hit per valid row across all vocab tiles (target < V),
        # so the lane-reduce recovers the gathered log-prob exactly.
        picked = jnp.sum(jnp.where(hit, lp_ref[...], 0), axis=1, keepdims=True)
        acc_ref[...] += picked.astype(jnp.float32)

        @pl.when(j == pl.num_programs(1) - 1)
        def _():
            # Gate the mask on row validity too (edge-block mask bytes are
            # undefined and could be NaN).
            msk = jnp.where(row_valid, msk_ref[...], 0.0)
            out_ref[...] = -acc_ref[...] * msk

    return kernel


def language_model_criterion(inp, target, mask, *, tile_r=512, tile_v=2048):
    """Forward of LanguageModelCriterion.

    inp:    (B, T, V) float32/bfloat16 log-probabilities
    target: (B, T')   int     (T' >= T; truncated to T like the PyTorch module)
    mask:   (B, T')   float   (T' >= T; truncated to T)
    returns scalar loss = sum(-inp.gather(target) * mask) / sum(mask)
            (sum(mask) == 0 yields NaN, matching the PyTorch module)
    """
    B, T, V = inp.shape
    target = target[:, :T]
    mask = mask[:, :T]

    R = B * T
    lp = inp.reshape(R, V)
    tgt = target.reshape(R, 1).astype(jnp.int32)
    msk = mask.reshape(R, 1).astype(jnp.float32)   # denominator always in f32

    # Sublane granularity: 8 for f32, 16 for bf16 (packed sublanes).
    sub = 16 if lp.dtype == jnp.bfloat16 else 8
    # Aim for >= 2 row tiles so the "parallel" axis feeds both v7x TensorCores,
    # without exceeding the requested tile size.
    tile_r_eff = max(sub, min(tile_r, _round_up(pl.cdiv(R, 2), sub)))
    tile_v_eff = min(tile_v, _round_up(V, 128))

    grid = (pl.cdiv(R, tile_r_eff), pl.cdiv(V, tile_v_eff))

    # Cover the double-buffered lp tile plus slack; safe on v5e/v6e/v7x.
    lp_tile_bytes = tile_r_eff * tile_v_eff * lp.dtype.itemsize
    vmem_limit = min(max(int(2.5 * lp_tile_bytes) + (4 << 20), 32 << 20),
                     64 << 20)

    per_row = pl.pallas_call(
        _make_kernel(R, tile_r_eff, tile_v_eff),
        out_shape=jax.ShapeDtypeStruct((R, 1), jnp.float32),
        grid=grid,
        in_specs=[
            pl.BlockSpec((tile_r_eff, tile_v_eff), lambda i, j: (i, j)),
            pl.BlockSpec((tile_r_eff, 1), lambda i, j: (i, 0)),
            pl.BlockSpec((tile_r_eff, 1), lambda i, j: (i, 0)),
        ],
        out_specs=pl.BlockSpec((tile_r_eff, 1), lambda i, j: (i, 0)),
        scratch_shapes=[pltpu.VMEM((tile_r_eff, 1), jnp.float32)],
        compiler_params=pltpu.CompilerParams(
            dimension_semantics=("parallel", "arbitrary"),
            vmem_limit_bytes=vmem_limit),
    )(lp, tgt, msk)

    # Tiny final reductions + division: R floats, done as plain JAX glue.
    num = jnp.sum(per_row)
    den = jnp.sum(msk)
    return num / den


if __name__ == "__main__":
    # Small shapes consistent with the module: input is (B, T, V) log-probs,
    # target/mask come in longer than T and are truncated by the criterion.
    B, T, V = 2, 8, 512
    T_full = T + 2

    key = jax.random.PRNGKey(0)
    k1, k2 = jax.random.split(key, 2)

    logits = jax.random.normal(k1, (B, T, V), dtype=jnp.float32)
    logprobs = jax.nn.log_softmax(logits, axis=-1)          # the "input"
    target = jax.random.randint(k2, (B, T_full), 0, V, dtype=jnp.int32)
    lengths = jnp.array([7, 5], dtype=jnp.int32)
    mask = (jnp.arange(T_full)[None, :] < lengths[:, None]).astype(jnp.float32)

    loss = language_model_criterion(logprobs, target, mask)
    loss = jax.block_until_ready(loss)

    # Pure-JAX reference (mirrors the PyTorch module exactly).
    tgt_t = target[:, :T]
    msk_t = mask[:, :T]
    lp2 = logprobs.reshape(B * T, V)
    picked = jnp.take_along_axis(lp2, tgt_t.reshape(-1, 1), axis=1)
    ref = jnp.sum(-picked * msk_t.reshape(-1, 1)) / jnp.sum(msk_t)

    assert loss.shape == ()
    assert jnp.allclose(loss, ref, atol=1e-5, rtol=1e-5)

    print("KERNEL_OK")
</pallas_src>

<mosaic_0001>
module attributes {stable_mosaic.version = 11 : i64} {
  func.func @kernel(%arg0: i32, %arg1: i32, %arg2: memref<8x512xf32, #tpu.memory_space<vmem>>, %arg3: memref<8x1xi32, #tpu.memory_space<vmem>>, %arg4: memref<8x1xf32, #tpu.memory_space<vmem>>, %arg5: memref<8x1xf32, #tpu.memory_space<vmem>>, %arg6: memref<8x1xf32, #tpu.memory_space<vmem>>) attributes {dimension_semantics = [#tpu.dimension_semantics<parallel>, #tpu.dimension_semantics<arbitrary>], iteration_bounds = array<i64: 2, 1>, scalar_prefetch = 0 : i64, scratch_operands = 1 : i64, tpu.core_type = #tpu.core_type<tc>, window_params = [{transform_indices = @transform_0, window_bounds = array<i64: 8, 512>}, {transform_indices = @transform_1, window_bounds = array<i64: 8, 1>}, {transform_indices = @transform_2, window_bounds = array<i64: 8, 1>}, {transform_indices = @transform_3, window_bounds = array<i64: 8, 1>}]} {
    %c0_i32 = arith.constant 0 : i32
    %0 = arith.cmpi eq, %arg1, %c0_i32 : i32
    %1 = arith.extui %0 : i1 to i32
    %c0_i32_0 = arith.constant 0 : i32
    %2 = arith.cmpi ne, %1, %c0_i32_0 : i32
    scf.if %2 {
      %cst_11 = arith.constant 0.000000e+00 : f32
      %30 = vector.broadcast %cst_11 : f32 to vector<8x1xf32>
      %c0_12 = arith.constant 0 : index
      %c0_13 = arith.constant 0 : index
      %31 = vector.load %arg6[%c0_12, %c0_13] : memref<8x1xf32, #tpu.memory_space<vmem>>, vector<8x1xf32>
      tpu.vector_store %arg6[%c0_12, %c0_13], %30 {strides = array<i32>} : memref<8x1xf32, #tpu.memory_space<vmem>>, vector<8x1xf32>,
    } else {
    }
    %3 = tpu.iota {dimensions = array<i32: 0>} : vector<8x1xi32>
    %c8_i32 = arith.constant 8 : i32
    %4 = arith.muli %arg0, %c8_i32 : i32
    %5 = vector.broadcast %4 : i32 to vector<8x1xi32>
    %6 = arith.addi %3, %5 : vector<8x1xi32>
    %c16_i32 = arith.constant 16 : i32
    %7 = vector.broadcast %c16_i32 : i32 to vector<8x1xi32>
    %8 = arith.cmpi slt, %6, %7 : vector<8x1xi32>
    %c0 = arith.constant 0 : index
    %c0_1 = arith.constant 0 : index
    %9 = vector.load %arg3[%c0, %c0_1] : memref<8x1xi32, #tpu.memory_space<vmem>>, vector<8x1xi32>
    %c512_i32 = arith.constant 512 : i32
    %10 = arith.muli %arg1, %c512_i32 : i32
    %11 = vector.broadcast %10 : i32 to vector<8x1xi32>
    %12 = arith.subi %9, %11 : vector<8x1xi32>
    %c-1_i32 = arith.constant -1 : i32
    %13 = vector.broadcast %c-1_i32 : i32 to vector<8x1xi32>
    %14 = arith.select %8, %12, %13 : vector<8x1xi1>, vector<8x1xi32>
    %15 = tpu.iota {dimensions = array<i32: 1>} : vector<8x512xi32>
    %16 = vector.broadcast %14 : vector<8x1xi32> to vector<8x512xi32>
    %17 = arith.cmpi eq, %15, %16 : vector<8x512xi32>
    %c0_2 = arith.constant 0 : index
    %c0_3 = arith.constant 0 : index
    %18 = vector.load %arg2[%c0_2, %c0_3] : memref<8x512xf32, #tpu.memory_space<vmem>>, vector<8x512xf32>
    %c0_i32_4 = arith.constant 0 : i32
    %19 = arith.sitofp %c0_i32_4 : i32 to f32
    %20 = vector.broadcast %19 : f32 to vector<8x512xf32>
    %21 = arith.select %17, %18, %20 : vector<8x512xi1>, vector<8x512xf32>
    %cst = arith.constant dense<0.000000e+00> : vector<8xf32>
    %22 = vector.multi_reduction <add>, %21, %cst [1] : vector<8x512xf32> to vector<8xf32>
    %23 = vector.shape_cast %22 : vector<8xf32> to vector<8x1xf32>
    %c0_5 = arith.constant 0 : index
    %c0_6 = arith.constant 0 : index
    %24 = vector.load %arg6[%c0_5, %c0_6] : memref<8x1xf32, #tpu.memory_space<vmem>>, vector<8x1xf32>
    %25 = arith.addf %24, %23 : vector<8x1xf32>
    %c0_7 = arith.constant 0 : index
    %c0_8 = arith.constant 0 : index
    %26 = vector.load %arg6[%c0_7, %c0_8] : memref<8x1xf32, #tpu.memory_space<vmem>>, vector<8x1xf32>
    tpu.vector_store %arg6[%c0_7, %c0_8], %25 {strides = array<i32>} : memref<8x1xf32, #tpu.memory_space<vmem>>, vector<8x1xf32>,
    %c0_i32_9 = arith.constant 0 : i32
    %27 = arith.cmpi eq, %arg1, %c0_i32_9 : i32
    %28 = arith.extui %27 : i1 to i32
    %c0_i32_10 = arith.constant 0 : i32
    %29 = arith.cmpi ne, %28, %c0_i32_10 : i32
    scf.if %29 {
      %c0_11 = arith.constant 0 : index
      %c0_12 = arith.constant 0 : index
      %30 = vector.load %arg4[%c0_11, %c0_12] : memref<8x1xf32, #tpu.memory_space<vmem>>, vector<8x1xf32>
      %cst_13 = arith.constant 0.000000e+00 : f32
      %31 = vector.broadcast %cst_13 : f32 to vector<8x1xf32>
      %32 = arith.select %8, %30, %31 : vector<8x1xi1>, vector<8x1xf32>
      %c0_14 = arith.constant 0 : index
      %c0_15 = arith.constant 0 : index
      %33 = vector.load %arg6[%c0_14, %c0_15] : memref<8x1xf32, #tpu.memory_space<vmem>>, vector<8x1xf32>
      %cst_16 = arith.constant 0.000000e+00 : f32
      %34 = vector.broadcast %cst_16 : f32 to vector<8x1xf32>
      %35 = arith.subf %34, %33 : vector<8x1xf32>
      %36 = arith.mulf %35, %32 : vector<8x1xf32>
      %c0_17 = arith.constant 0 : index
      %c0_18 = arith.constant 0 : index
      %37 = vector.load %arg5[%c0_17, %c0_18] : memref<8x1xf32, #tpu.memory_space<vmem>>, vector<8x1xf32>
      tpu.vector_store %arg5[%c0_17, %c0_18], %36 {strides = array<i32>} : memref<8x1xf32, #tpu.memory_space<vmem>>, vector<8x1xf32>,
    } else {
    }
    return
  }
  func.func @transform_0(%arg0: i32, %arg1: i32) -> (i32, i32) {
    %c0_i32 = arith.constant 0 : i32
    return %arg0, %arg1 : i32, i32
  }
  func.func @transform_1(%arg0: i32, %arg1: i32) -> (i32, i32) {
    %c0_i32 = arith.constant 0 : i32
    %c0_i32_0 = arith.constant 0 : i32
    return %arg0, %c0_i32 : i32, i32
  }
  func.func @transform_2(%arg0: i32, %arg1: i32) -> (i32, i32) {
    %c0_i32 = arith.constant 0 : i32
    %c0_i32_0 = arith.constant 0 : i32
    return %arg0, %c0_i32 : i32, i32
  }
  func.func @transform_3(%arg0: i32, %arg1: i32) -> (i32, i32) {
    %c0_i32 = arith.constant 0 : i32
    %c0_i32_0 = arith.constant 0 : i32
    return %arg0, %c0_i32 : i32, i32
  }
}

</mosaic_0001>

<bundles_post_ra>
// kernel: tpu_custom_call.1
= control target key start
LH: loop header
LB: loop body
LE: loop exit
PB: predicated region body
PF: predicated region fallthrough
CT: control target
= control target key end

     0   :  { %8 = vsyncpa [#allocation4], 0  ;;  %s718_s0 = inlined_call_operand.hbm [shape: f32[16,512], index: 0, kind: input, shape index: {}]   ;;  %s719_s1 = inlined_call_operand.vmem [shape: s32[16,1], index: 1, kind: input, shape index: {}]   ;;  %s720_s2 = inlined_call_operand.vmem [shape: f32[16,1], index: 2, kind: input, shape index: {}]   ;;  %s721_s3 = inlined_call_operand.vmem [shape: f32[16,1], index: 3, kind: output, shape index: {}]  }
   0x1   :  { %10 = vsyncpa [#allocation4 + $0x1], 0  ;;  %s572_s12 = smov 0   ;;  %s574_s13 = smov 0  }
   0x2   :  { %s576_s14 = smov 0   ;;  %s578_s15 = smov 0  }
   0x3   :  { %s580_s16 = smov 0   ;;  %s582_s17 = smov 0  }
   0x4 LB: > { %s393_s18 = sadd.s32 4294967295, %s547_s17   ;;  %s28_s19 = sadd.s32 1, %s543_s16  ;;  %s547_s17 = sphi %s582_s17, %s16_s17   ;;  %s543_s16 = sphi %s580_s16, %s731_s16   ;;  %s539_s15 = sphi %s578_s15, %s730_s15   ;;  %s535_s14 = sphi %s576_s14, %s729_s14   ;;  %s531_s13 = sphi %s574_s13, %s728_s13   ;;  %s527_s12 = sphi %s572_s12, %s727_s12  }
   0x5   : > { %p30_p0 = scmp.ge.s32.totalorder %s28_s19, 2  ;;  %s37_s20 = sadd.s32 1, %s535_s14 }
   0x6   : > { %p44_p1 = scmp.ne.s32.totalorder %s535_s14, %s531_s13  ;;  %p45_p2 = scmp.eq.s32.totalorder %s547_s17, 0 }
   0x7   : > { %s733_s19 = smov (%p30_p0, %s28_s19), 0  ;;  %p50_p4 = scmp.ne.s32.totalorder %s531_s13, %s527_s12 }
   0x8   : > { %p608_p3 = por %p45_p2, %p44_p1  ;;  %s32_s22 = ssub.s32 %s543_s16, %s733_s19 }
   0x9   : > { %p51_p5 = scmp.eq.s32.totalorder %s393_s18, 0  ;;  %p35_p6 = scmp.eq.s32.totalorder %s32_s22, 0 }
   0xa   : > { %p415_p8 = scmp.lt.s32.totalorder %s547_s17, 2  ;;  %s152_s25 = sand.u32 1, %s535_s14  }
   0xb   : > { %p615_p7 = por %p51_p5, %p50_p4  ;;  %s408_s26 = sshll.u32 %s543_s16, 9 }
   0xc   : > { %s621_s24 = scalar_select %p35_p6, %s535_s14, %s37_s20  }
   0xd   : > { %s397_s27 = sshll.u32 %s152_s25, 5  ;;  %s628_s30 = scalar_lea.hbm %s718_s0, %s408_s26 }
   0xe   : > { %s156_s4 = scalar_lea.vmem [#allocation3], %s397_s27  ;;  %p632_p9 = pnand %p415_p8, %p608_p3 }
   0xf   : > { %s166_s5 = sshll.u32 %s156_s4, 4  ;;  %s153_s7 = scalar_lea.sflag [#allocation4], %s152_s25  ;;  %s636_s5 = int_to_ptr.vmem [resolvable:$true] %s166_s5 }
  0x10   : > { %s467_s8 = scalar_lea.hbm %s628_s30, 512  ;;  %p469_p13 = pneg %p632_p9 }
  0x11   : > { %p468_p12 = scmp.ne.s32.totalorder %s628_s30, %s467_s8  ;;  %s472_s11 = scalar_lea.hbm %s718_s0, 1024 }
  0x12   : > { %p473_p2 = scmp.lt.u32.totalorder %s628_s30, %s718_s0  ;;  %p474_p3 = scmp.lt.u32.totalorder %s472_s11, %s467_s8 }
  0x13   : > { %p470_p0 = pnand %p469_p13, %p468_p12  ;;  %p476_p5 = scmp.lt.u32.totalorder %s467_s8, %s628_s30 }
  0x14   : > { %p475_p4 = por %p474_p3, %p473_p2 }
  0x15   : > { %p471_p1 = pneg %p470_p0 }
  0x16   : > { %p477_p6 = por %p476_p5, %p475_p4 }
  0x18   : > { %p478_p8 = pnand %p477_p6, %p471_p1 }
  0x1a   : > { %481 = shalt.err (!%p478_p8)
}
  0x1b   : > { %s482_s20 = scalar_lea.vmem %s636_s5, 512  ;;  %s549_s21 = smov [#allocation3]  }
  0x1c   : > { %p483_p12 = scmp.ne.s32.totalorder %s636_s5, %s482_s20  ;;  %s487_s22 = sshll.u32 %s549_s21, 4  ;;  %s488_s22 = int_to_ptr.vmem [resolvable:$false] %s487_s22 }
  0x1d   : > { %s489_s25 = scalar_lea.vmem %s488_s22, 1024  ;;  %p490_p11 = scmp.lt.s32.totalorder %s636_s5, %s488_s22 }
  0x1e   : > { %p485_p0 = pnand %p483_p12, %p469_p13  ;;  %p491_p2 = scmp.lt.s32.totalorder %s489_s25, %s482_s20 }
  0x20   : > { %p486_p10 = pneg %p485_p0  ;;  %p492_p3 = por %p491_p2, %p490_p11 }
  0x22   : > { %p493_p4 = pnand %p492_p3, %p486_p10 }
  0x24   : > { %496 = shalt.err (!%p493_p4)
}
  0x25   : > { %414 = dma.hbm_to_vmem [thread:$0]  (!%p632_p9), %s628_s30, 512, %s636_s5, %s153_s7  }
  0x26   : > { %p725_p1 = scmp.lt.s32.totalorder %s547_s17, 3  ;;  %p726_p5 = scmp.ge.s32.totalorder %s547_s17, 1 }
  0x28   : > { %p186_p13 = pnand %p726_p5, %p725_p1 }
  0x29   : > { %s191_s26 = sand.u32 (!%p186_p13), 1, %s531_s13  }
  0x2a   : > { %189 = sbr.rel (%p186_p13) target bundleno = 351 (0x15f), region = 32  ;;  %s401_s27 = sshll.u32 (!%p186_p13), %s191_s26, 5 }
  0x2b   : > { %s192_s28 = scalar_lea.sflag (!%p186_p13), [#allocation4], %s191_s26  ;;  %s670_s29 = scalar_lea.vmem (!%p186_p13), [#allocation3], %s401_s27 }
  0x31   : > { %522 = dma.done.wait (%p615_p7), %s192_s28, 512  }
  0x32   : > { %524 = vsyncadd (%p615_p7), %s192_s28, 4294966784  ;;  %p226_p9 = scmp.lt.s32.totalorder %s539_s15, 1  ;;  %v244_v0 = vlaneseq  ;;  %s405_s30 = sshll.u32 %s539_s15, 3  ;;  %v550_v1 = vmov 0   ;;  %vm242_vm1 = vcmask 7168   ;;  %v551_v9 = vmov 0.0  }
  0x33   : > { %466 = vset.pattern.permute.xlu0 %v550_v1  ;;  %v247_v2 = vstv %s405_s30  ;;  %243 = vst.msk [vmem:[#allocation2] sm:$0xff] %vm242_vm1, %v551_v9  ;;  %v267_v14 = vld [vmem:[%s670_s29] sm:$0xff]  ;;  %v268_v15 = vld [vmem:[%s670_s29 + $0x8] sm:$0xff]  ;;  %v269_v17 = vld [vmem:[%s670_s29 + $0x10] sm:$0xff] }
  0x34   : > { %s735_s15 = smov (!%p226_p9, %s539_s15), 1  ;;  %v245_v3 = vshrl.u32 %v244_v0, 7  ;;  %v256_v10 = vand.u32 127, %v244_v0  ;;  %v270_v20 = vld [vmem:[%s670_s29 + $0x18] sm:$0xff] }
  0x35   : > { %s679_s4 = sshll.u32 %s735_s15, 3 }
  0x36   : > { %v248_v4 = vadd.s32 %v247_v2, %v245_v3  ;;  %s229_s23 = scalar_lea.vmem %s719_s1, %s679_s4  ;;  %s233_s9 = scalar_lea.vmem %s720_s2, %s679_s4  ;;  %v257_v11 = vadd.s32 128, %v256_v10  ;;  %v258_v12 = vadd.s32 256, %v256_v10  ;;  %v259_v13 = vadd.s32 384, %v256_v10 }
  0x37   : > { %v250_v5 = vld [vmem:[%s229_s23] sm:$0xff]  ;;  %s237_s11 = scalar_lea.vmem %s721_s3, %s679_s4 }
  0x38   : > { %vm249_vm0 = vcmp.lt.s32.totalorder %v248_v4, 16  ;;  %v287_v6 = vld [vmem:[%s233_s9] sm:$0xff] }
  0x39   : > { %v254_v7 = vsel %vm249_vm0, %v250_v5, 4294967295  ;;  %v288_v8 = vsel %vm249_vm0, %v287_v6, 0.0 }
  0x3a   : > { %261 = vperm.xlu0 %466, %v254_v7   ;;  %v280_v26 = vld [vmem:[#allocation2] sm:$0xff] }
  0xb9   : > { %v262_v16 = vpop.permute.xlu0 %261 }
  0xba   : > { %vm263_vm2 = vcmp.eq.s32.totalorder %v256_v10, %v262_v16  ;;  %vm264_vm3 = vcmp.eq.s32.totalorder %v257_v11, %v262_v16  ;;  %vm265_vm4 = vcmp.eq.s32.totalorder %v258_v12, %v262_v16  ;;  %vm266_vm5 = vcmp.eq.s32.totalorder %v259_v13, %v262_v16 }
  0xbb   : > { %v271_v18 = vsel %vm263_vm2, %v267_v14, 0.0  ;;  %v272_v19 = vsel %vm264_vm3, %v268_v15, 0.0  ;;  %v273_v22 = vsel %vm265_vm4, %v269_v17, 0.0  ;;  %v274_v24 = vsel %vm266_vm5, %v270_v20, 0.0 }
  0xbc   : > { %v275_v21 = vadd.f32 %v272_v19, %v271_v18 }
  0xbe   : > { %v276_v23 = vadd.f32 %v275_v21, %v273_v22 }
  0xc0   : > { %v277_v25 = vadd.f32 %v276_v23, %v274_v24 }
  0xc2   : > { %278 = vadd.xlane.f32.xlu0 %v277_v25 }
 0x14f   : > { %v279_v27 = vpop.xlane.xlu0 %278 }
 0x150   : > { %v281_v28 = vadd.f32 %v280_v26, %v279_v27 }
 0x152   : > { %283 = vst.msk [vmem:[#allocation2] sm:$0xff] %vm242_vm1, %v281_v28 }
 0x159   : > { %v289_v29 = vld [vmem:[#allocation2] sm:$0xff] }
 0x15a   : > { %v290_v30 = vsub.f32 0.0, %v289_v29 }
 0x15c   : > { %v291_v31 = vmul.f32 %v290_v30, %v288_v8 }
 0x15e   : > { %292 = vst.msk [vmem:[%s237_s11] sm:$0xff] %vm242_vm1, %v291_v31 }
 0x15f PF: > { %s16_s17 = sadd.s32 1, %s547_s17   ;;  %s727_s12 = smov %s531_s13 }
 0x160   : > { %p13_p7 = scmp.ge.s32.totalorder %s16_s17, 4   ;;  %s728_s13 = smov %s535_s14 }
 0x161   : > { %s729_s14 = smov %s621_s24  ;;  %s730_s15 = smov %s543_s16 }
 0x162   : > { %s731_s16 = smov %s733_s19  ;;  %15 = sbr.rel (!%p13_p7) target bundleno = 4 (0x4), region = 86 }
 0x169   :  { %312 = vsyncpa [#allocation4], 1 }
 0x16a   :  { %314 = vsyncpa [#allocation4 + $0x1], 1 }

</bundles_post_ra>
